<compile_context>
chip_gen: v5e
topology: v5e:2x2
jax: 0.10.0
libtpu: 0.0.40
codegen_flags: <defaults>
</compile_context>

<pallas_src>
import jax
import jax.numpy as jnp
from jax.experimental import pallas as pl
from jax.experimental.pallas import tpu as pltpu

DEFAULT_BLOCK_ROWS = 512  # output rows per grid step


def _round_up(x, m):
    return ((x + m - 1) // m) * m


def _embed_gather_kernel(idx_ref, w_ref, o_ref):
    # idx_ref: VMEM int32[TM, 1]            indices for this tile
    # w_ref:   VMEM f32[n_labels, emb_dim]  full table, resident across grid
    # o_ref:   VMEM f32[TM, emb_dim]        output tile
    tm = o_ref.shape[0]
    n_labels = w_ref.shape[0]
    ids = idx_ref[...]                                               # (TM, 1)
    labels = jax.lax.broadcasted_iota(jnp.int32, (tm, n_labels), 1)  # (TM, n_labels)
    one_hot = (ids == labels).astype(w_ref.dtype)                    # lane-broadcast compare
    # One MXU matmul does the whole gather; single dense full-tile store.
    o_ref[...] = jnp.dot(
        one_hot, w_ref[...], preferred_element_type=jnp.float32
    ).astype(o_ref.dtype)


def label_embed_forward(idx, weight, dropout_p=0.0, block_rows=DEFAULT_BLOCK_ROWS):
    """Pallas equivalent of LabelEmbedModel.forward (inference, dropout_p == 0)."""
    # TODO(synk): dropout_p > 0 (training) would need pltpu.prng_seed + stateful_bernoulli.
    assert dropout_p == 0.0, "only the inference path (dropout_p == 0) is implemented"
    n_labels, emb_dim = weight.shape
    # One-hot MXU gather is the right regime for small/medium label vocabularies.
    # TODO(synk): DMA-gather path (memory_space=pl.ANY + async row copies) for n_labels > 1024.
    assert n_labels <= 1024, "one-hot gather path assumes a small label vocabulary"

    idx_shape = idx.shape
    idx_flat = idx.reshape(-1).astype(jnp.int32)
    n_rows = idx_flat.shape[0]

    # Rows per grid step: large enough to amortize per-step pipeline overhead,
    # capped and sublane-aligned for tiny inputs (the demo uses tm == n_rows).
    tm = min(block_rows, _round_up(n_rows, 8))
    n_rows_padded = _round_up(n_rows, tm)
    if n_rows_padded != n_rows:
        # Only the tiny int32 index vector is padded; no output pad/slice.
        idx_flat = jnp.pad(idx_flat, (0, n_rows_padded - n_rows))
    idx_col = idx_flat.reshape(n_rows_padded, 1)

    grid = (n_rows_padded // tm,)

    out_flat = pl.pallas_call(
        _embed_gather_kernel,
        out_shape=jax.ShapeDtypeStruct((n_rows, emb_dim), weight.dtype),
        grid=grid,
        in_specs=[
            # per-step index column
            pl.BlockSpec((tm, 1), lambda i: (i, 0)),
            # full table, constant block index -> fetched once, VMEM-resident
            pl.BlockSpec((n_labels, emb_dim), lambda i: (0, 0)),
        ],
        out_specs=pl.BlockSpec((tm, emb_dim), lambda i: (i, 0)),
        compiler_params=pltpu.CompilerParams(
            # every grid step is independent -> shard across v7x's 2 TCs
            dimension_semantics=("parallel",),
        ),
    )(idx_col, weight)

    return out_flat.reshape(*idx_shape, emb_dim)


def init_label_embed_weights(key, n_labels, emb_dim, scale=0.0001, eye=False):
    """Deterministic parameter init matching LabelEmbedModel.init_weights."""
    if eye:
        w = jnp.zeros((n_labels, emb_dim), jnp.float32)
        d = min(n_labels, emb_dim)
        w = w.at[jnp.arange(d), jnp.arange(d)].set(1.0)
        return w
    return jax.random.uniform(
        key, (n_labels, emb_dim), jnp.float32, minval=-scale, maxval=scale)


if __name__ == "__main__":
    n_labels, emb_dim = 32, 128
    B, L = 2, 8

    key = jax.random.PRNGKey(0)
    k_w, k_idx = jax.random.split(key)

    weight = init_label_embed_weights(k_w, n_labels, emb_dim, eye=False)
    idx = jax.random.randint(k_idx, (B, L), 0, n_labels, dtype=jnp.int32)

    out = label_embed_forward(idx, weight, dropout_p=0.0)
    out = jax.block_until_ready(out)

    # reference check (plain JAX gather)
    ref = weight[idx]
    assert out.shape == (B, L, emb_dim)
    assert jnp.allclose(out, ref), "mismatch vs reference gather"

    print("KERNEL_OK")
</pallas_src>

<mosaic_0001>
module attributes {stable_mosaic.version = 11 : i64} {
  func.func @_embed_gather_kernel(%arg0: i32, %arg1: memref<16x1xi32, #tpu.memory_space<vmem>>, %arg2: memref<32x128xf32, #tpu.memory_space<vmem>>, %arg3: memref<16x128xf32, #tpu.memory_space<vmem>>) attributes {dimension_semantics = [#tpu.dimension_semantics<parallel>], iteration_bounds = array<i64: 1>, scalar_prefetch = 0 : i64, scratch_operands = 0 : i64, tpu.core_type = #tpu.core_type<tc>, window_params = [{transform_indices = @transform_0, window_bounds = array<i64: 16, 1>}, {pipeline_mode = #tpu.pipeline_mode<synchronous>, transform_indices = @transform_1, window_bounds = array<i64: 32, 128>}, {transform_indices = @transform_2, window_bounds = array<i64: 16, 128>}]} {
    %c0 = arith.constant 0 : index
    %c0_0 = arith.constant 0 : index
    %0 = vector.load %arg1[%c0, %c0_0] : memref<16x1xi32, #tpu.memory_space<vmem>>, vector<16x1xi32>
    %1 = tpu.iota {dimensions = array<i32: 1>} : vector<16x32xi32>
    %2 = vector.broadcast %0 : vector<16x1xi32> to vector<16x32xi32>
    %3 = arith.cmpi eq, %2, %1 : vector<16x32xi32>
    %4 = arith.extui %3 : vector<16x32xi1> to vector<16x32xi32>
    %5 = arith.sitofp %4 : vector<16x32xi32> to vector<16x32xf32>
    %c0_1 = arith.constant 0 : index
    %c0_2 = arith.constant 0 : index
    %6 = vector.load %arg2[%c0_1, %c0_2] : memref<32x128xf32, #tpu.memory_space<vmem>>, vector<32x128xf32>
    %cst = arith.constant dense<0.000000e+00> : vector<16x128xf32>
    %7 = tpu.matmul %5, %6, %cst {dimension_numbers = #tpu.dot_dimension_numbers<[1], [0], [0], [1], [0, 0, 1, 1], [], []>} : vector<16x32xf32>, vector<32x128xf32>, vector<16x128xf32> -> vector<16x128xf32>
    %c0_3 = arith.constant 0 : index
    %c0_4 = arith.constant 0 : index
    %8 = vector.load %arg3[%c0_3, %c0_4] : memref<16x128xf32, #tpu.memory_space<vmem>>, vector<16x128xf32>
    tpu.vector_store %arg3[%c0_3, %c0_4], %7 {strides = array<i32>} : memref<16x128xf32, #tpu.memory_space<vmem>>, vector<16x128xf32>,
    return
  }
  func.func @transform_0(%arg0: i32) -> (i32, i32) {
    %c0_i32 = arith.constant 0 : i32
    %c0_i32_0 = arith.constant 0 : i32
    return %arg0, %c0_i32 : i32, i32
  }
  func.func @transform_1(%arg0: i32) -> (i32, i32) {
    %c0_i32 = arith.constant 0 : i32
    %c0_i32_0 = arith.constant 0 : i32
    %c0_i32_1 = arith.constant 0 : i32
    return %c0_i32, %c0_i32_0 : i32, i32
  }
  func.func @transform_2(%arg0: i32) -> (i32, i32) {
    %c0_i32 = arith.constant 0 : i32
    %c0_i32_0 = arith.constant 0 : i32
    return %arg0, %c0_i32 : i32, i32
  }
}

</mosaic_0001>

<bundles_post_ra>
// kernel: tpu_custom_call.1
= control target key start
LH: loop header
LB: loop body
LE: loop exit
PB: predicated region body
PF: predicated region fallthrough
CT: control target
= control target key end

     0   :  { %7 = vsyncpa [#allocation3], 0  ;;  %s205_s0 = inlined_call_operand.vmem [shape: s32[16,1], index: 0, kind: input, shape index: {}]   ;;  %s206_s1 = inlined_call_operand.hbm [shape: f32[32,128], index: 1, kind: input, shape index: {}]   ;;  %s207_s2 = inlined_call_operand.hbm [shape: f32[16,128], index: 2, kind: output, shape index: {}]  }
   0x1   :  { %8 = vsyncpa [#allocation4], 0  ;;  %s15_s11 = sshll.u32 %s206_s1, 4  ;;  %s166_s12 = smov [#allocation2]   ;;  %s16_s11 = int_to_ptr.hbm [resolvable:$true] %s15_s11 }
   0x2   :  { %s17_s13 = sshll.u32 %s166_s12, 4  ;;  %s167_s14 = smov 128   ;;  %s18_s13 = int_to_ptr.vmem [resolvable:$true] %s17_s13 }
   0x3   :  { %s168_s15 = smov 8  }
   0x4   :  { %23 = dma.hbm_to_vmem [thread:$0]  %s16_s11, 512, %s18_s13, [#allocation3], %s167_s14, %s167_s14, %s168_s15  }
   0x5   :  { %162 = dma.done.wait [#allocation3], 512  }
   0x6   :  { %163 = vsyncadd [#allocation3], 4294966784  ;;  %v169_v0 = vmov 0   ;;  %v28_v1 = vld [vmem:[%s205_s0] sm:$0xff]  ;;  %v47_v2 = vld [vmem:[#allocation2 + $0x18] sm:$0xff]  ;;  %v30_v7 = vlaneseq  ;;  %vm48_vm0 = vcmask 261120  }
   0x7   :  { %113 = vset.pattern.permute.xlu0 %v169_v0  ;;  %67 = vmatpush.msra.mxu0 %v47_v2  ;;  %v46_v3 = vld [vmem:[#allocation2 + $0x10] sm:$0xff]  ;;  %v45_v4 = vld [vmem:[#allocation2 + $0x8] sm:$0xff]  ;;  %v44_v6 = vld [vmem:[#allocation2] sm:$0xff]  ;;  %v170_v10 = vmov 0.0   ;;  %s86_s22 = sshll.u32 %s207_s2, 4  ;;  %s87_s22 = int_to_ptr.hbm [resolvable:$true] %s86_s22 }
   0x8   :  { %33 = vperm.xlu0 %113, %v28_v1   ;;  %103 = vmatpush.msra.mxu1 %v47_v2  ;;  %v29_v5 = vld [vmem:[%s205_s0 + $0x8] sm:$0xff]  ;;  %v31_v8 = vand.u32 127, %v30_v7  ;;  %s171_s0 = smov [#allocation5]  }
   0x9   :  { %68 = vmatpush.msra.mxu0 %v46_v3  ;;  %s84_s19 = sshll.u32 %s171_s0, 4  ;;  %s85_s19 = int_to_ptr.vmem [resolvable:$true] %s84_s19 }
   0xa   :  { %104 = vmatpush.msra.mxu1 %v46_v3 }
   0xb   :  { %69 = vmatpush.msra.mxu0 %v45_v4 }
   0xc   :  { %105 = vmatpush.msra.mxu1 %v45_v4 }
   0xd   :  { %70 = vmatpush.msra.mxu0 %v44_v6 }
   0xe   :  { %106 = vmatpush.msra.mxu1 %v44_v6 }
  0x10   :  { %36 = vperm.xlu0 %113, %v29_v5  }
  0x7a   :  { %v34_v9 = vpop.permute.xlu0 %33 }
  0x7b   :  { %vm38_vm1 = vcmp.eq.s32.totalorder %v34_v9, %v31_v8 }
  0x7c   :  { %v99_v11 = vsel %vm38_vm1, 1.0, %v170_v10 }
  0x7d   :  { %101 = vmatmul.msk.f32.vlgmr.msra.gmra.mxu0 %vm48_vm0, %v99_v11 }
  0x82   :  { %v37_v12 = vpop.permute.xlu0 %36 }
  0x83   :  { %vm39_vm2 = vcmp.eq.s32.totalorder %v37_v12, %v31_v8 }
  0x84   :  { %v100_v13 = vsel %vm39_vm2, 1.0, %v170_v10 }
  0x85   :  { %102 = vmatmul.msk.f32.vlgmr.msra.gmra.mxu1 %vm48_vm0, %v100_v13 }
  0xfa   :  { %v72_v14 = vpop.f32.mrf.mxu0 }
  0xfb   :  { %78 = vst [vmem:[#allocation5] sm:$0xff] %v72_v14 }
 0x102   :  { %v75_v15 = vpop.f32.mrf.mxu1 }
 0x103   :  { %79 = vst [vmem:[#allocation5 + $0x8] sm:$0xff] %v75_v15 }
 0x104   :  { %92 = dma.vmem_to_hbm [thread:$0]  %s85_s19, 256, %s87_s22, [#allocation4], %s167_s14, %s167_s14, %s168_s15  }
 0x105   :  { %164 = dma.done.wait [#allocation4], 256  }
 0x106   :  { %165 = vsyncadd [#allocation4], 4294967040 }
 0x107   :  { %97 = vsyncpa [#allocation3], 1 }
 0x108   :  { %98 = vsyncpa [#allocation4], 1 }

</bundles_post_ra>
